<compile_context>
chip_gen: v7x
topology: tpu7x:2x2x1
jax: 0.10.0
libtpu: 0.0.40
codegen_flags: <defaults>
</compile_context>

<pallas_src>
import jax
import jax.numpy as jnp
from jax import lax
from jax.experimental import pallas as pl
from jax.experimental.pallas import tpu as pltpu


def _round_up(n, m):
    return ((n + m - 1) // m) * m


def _sublane_multiple(dtype):
    return {4: 8, 2: 16, 1: 32}.get(jnp.dtype(dtype).itemsize, 8)


def _chip_generation():
    """Best-effort TPU generation from device_kind; 0 if unknown."""
    try:
        kind = jax.devices()[0].device_kind.lower()
    except Exception:
        return 0
    for g in (7, 6, 5, 4):
        if str(g) in kind:
            return g
    return 0


def _ln_stats(x_f32):
    """One-pass LayerNorm stats: mean and rsqrt(var + eps) over the last dim."""
    h_inv = 1.0 / x_f32.shape[-1]
    s = jnp.sum(x_f32, axis=-1, keepdims=True)
    s2 = jnp.sum(x_f32 * x_f32, axis=-1, keepdims=True)
    mean = s * h_inv
    var = s2 * h_inv - mean * mean
    inv = lax.rsqrt(var + 1e-6)
    return mean, inv


def final_layer_kernel(x_ref, shift_ref, scale_ref, wlin_ref, blin_ref, out_ref):
    """LN (no affine, eps=1e-6) + modulate + linear, modulate done in-kernel."""
    x = x_ref[0].astype(jnp.float32)                 # (T_TILE, H)
    mean, inv = _ln_stats(x)
    shift = shift_ref[0].astype(jnp.float32)         # (1, H)
    gain = 1.0 + scale_ref[0].astype(jnp.float32)    # (1, H)
    mod = ((x - mean) * inv) * gain + shift          # fused modulate, f32

    lhs = mod.astype(x_ref.dtype)                    # bf16 MXU path when x is bf16
    out = jnp.dot(lhs, wlin_ref[...], preferred_element_type=jnp.float32)
    out_ref[0] = (out + blin_ref[...].astype(jnp.float32)).astype(out_ref.dtype)


def final_layer_kernel_folded(x_ref, wmod_ref, bias_ref, out_ref):
    """LN + matmul only; modulate folded into per-batch W_b / bias_b (v7x path)."""
    x = x_ref[0].astype(jnp.float32)                 # (T_TILE, H)
    mean, inv = _ln_stats(x)
    x_norm = (x - mean) * inv

    lhs = x_norm.astype(x_ref.dtype)
    out = jnp.dot(lhs, wmod_ref[0], preferred_element_type=jnp.float32)
    out_ref[0] = (out + bias_ref[0].astype(jnp.float32)).astype(out_ref.dtype)


def final_layer(x, c, w_ada, b_ada, w_lin, b_lin, *,
                t_tile=None, fold_modulate=None, trim_output=True):
    """x: [B,T,H], c: [B,H], w_ada: [H,2H], b_ada: [2H], w_lin: [H,OUT], b_lin: [OUT]."""
    B, T, H = x.shape
    OUT = w_lin.shape[1]
    gen = _chip_generation()

    if fold_modulate is None:
        # v7x-class parts are VALU-bound -> fold; v5e/v6e are DMA-bound -> keep
        # modulate in-kernel (avoids per-batch re-read of the weight slab).
        fold_modulate = gen >= 7

    # ---- adaLN branch hoisted out of the kernel (tiny matmul, handled by XLA) ----
    c32 = c.astype(jnp.float32)
    silu_c = c32 * jax.nn.sigmoid(c32)
    ada = silu_c @ w_ada.astype(jnp.float32) + b_ada.astype(jnp.float32)   # (B, 2H)
    shift, scale = ada[:, :H], ada[:, H:]

    # ---- lane-dense output: pad OUT to a multiple of 128 lanes ----
    OUT_pad = _round_up(OUT, 128)
    w_lin_p = jnp.pad(w_lin, ((0, 0), (0, OUT_pad - OUT))) if OUT_pad != OUT else w_lin
    b_lin_p = jnp.pad(b_lin, ((0, OUT_pad - OUT),)) if OUT_pad != OUT else b_lin

    # ---- token tile: dtype sublane multiple, enough grid steps, chip defaults ----
    m = _sublane_multiple(x.dtype)
    if t_tile is None:
        if gen >= 7:
            t_tile = 512 if H <= 1536 else 256      # 64 MiB VMEM/TC
        elif gen in (5, 6):
            t_tile = 1024                            # HBM-bound, 128 MiB VMEM
        else:
            t_tile = 512
    min_steps = max(1, pl.cdiv(8, max(B, 1)))        # want B * t_steps >= ~8
    t_from_steps = _round_up(pl.cdiv(T, min_steps), m)
    T_TILE = max(m, min(int(t_tile), _round_up(T, m), t_from_steps))
    T_TILE = _round_up(T_TILE, m)

    # ---- honest VMEM budget (tiles + weights + in-body f32 temporaries) ----
    xsize = jnp.dtype(x.dtype).itemsize
    wsize = jnp.dtype(w_lin.dtype).itemsize
    vmem_cap = (100 << 20) if gen in (5, 6) else (56 << 20)

    def _vmem_needed(tt):
        need = 2 * tt * H * xsize                    # x tile, double-buffered
        need += 2 * tt * OUT_pad * xsize             # out tile, double-buffered
        if fold_modulate:
            need += 2 * (H * OUT_pad * wsize + OUT_pad * 4)          # W_b, bias_b
        else:
            need += 2 * (H * OUT_pad * wsize + OUT_pad * wsize + 2 * H * 4)
        need += 3 * tt * H * 4                       # f32 x / x*x / mod live ranges
        need += tt * OUT_pad * 4                     # f32 matmul accumulator
        need += 2 << 20                              # slack
        return need

    while _vmem_needed(T_TILE) > vmem_cap and T_TILE > m:
        T_TILE = max(m, _round_up(T_TILE // 2, m))
    vmem_limit = int(min(vmem_cap, max(_vmem_needed(T_TILE) + (4 << 20), 32 << 20)))

    grid = (B, pl.cdiv(T, T_TILE))                   # ragged last t-block handled by Pallas

    cost = pl.CostEstimate(
        flops=2 * B * T * H * OUT_pad + 8 * B * T * H,
        transcendentals=B * T,
        bytes_accessed=(B * T * H * xsize + B * T * OUT_pad * xsize
                        + (B if fold_modulate else 1) * H * OUT_pad * wsize
                        + 2 * B * H * 4 + OUT_pad * 4),
    )

    if fold_modulate:
        # Fold modulate into per-batch weights/bias (exact reassociation of the math).
        w_mod = ((1.0 + scale)[:, :, None] * w_lin_p.astype(jnp.float32)[None]
                 ).astype(w_lin.dtype)                               # (B, H, OUT_pad)
        bias_mod = (shift @ w_lin_p.astype(jnp.float32)
                    + b_lin_p.astype(jnp.float32)).reshape(B, 1, OUT_pad)  # f32
        kernel = final_layer_kernel_folded
        in_specs = [
            pl.BlockSpec((1, T_TILE, H), lambda b, t: (b, t, 0)),    # x tile
            pl.BlockSpec((1, H, OUT_pad), lambda b, t: (b, 0, 0)),   # per-batch W_b
            pl.BlockSpec((1, 1, OUT_pad), lambda b, t: (b, 0, 0)),   # per-batch bias_b
        ]
        operands = (x, w_mod, bias_mod)
    else:
        shift3 = shift.reshape(B, 1, H)
        scale3 = scale.reshape(B, 1, H)
        b_lin2 = b_lin_p.reshape(1, OUT_pad)
        kernel = final_layer_kernel
        in_specs = [
            pl.BlockSpec((1, T_TILE, H), lambda b, t: (b, t, 0)),    # x tile
            pl.BlockSpec((1, 1, H), lambda b, t: (b, 0, 0)),         # shift
            pl.BlockSpec((1, 1, H), lambda b, t: (b, 0, 0)),         # scale
            pl.BlockSpec((H, OUT_pad), lambda b, t: (0, 0)),         # W_lin (resident)
            pl.BlockSpec((1, OUT_pad), lambda b, t: (0, 0)),         # b_lin (resident)
        ]
        operands = (x, shift3, scale3, w_lin_p, b_lin2)

    out_padded = pl.pallas_call(
        kernel,
        out_shape=jax.ShapeDtypeStruct((B, T, OUT_pad), x.dtype),
        grid_spec=pltpu.PrefetchScalarGridSpec(
            num_scalar_prefetch=0,
            grid=grid,
            in_specs=in_specs,
            out_specs=pl.BlockSpec((1, T_TILE, OUT_pad), lambda b, t: (b, t, 0)),
        ),
        compiler_params=pltpu.CompilerParams(
            dimension_semantics=("parallel", "parallel"),
            vmem_limit_bytes=vmem_limit,
        ),
        cost_estimate=cost,
    )(*operands)

    if trim_output and OUT_pad != OUT:
        # TODO(synk): fuse this depad slice into the downstream unpatchify instead
        # of materializing a trimmed copy (pure overhead in a memory-bound layer).
        return out_padded[..., :OUT]
    return out_padded


def final_layer_ref(x, c, w_ada, b_ada, w_lin, b_lin):
    """Pure-JAX reference matching the PyTorch forward."""
    H = x.shape[-1]
    silu_c = c * jax.nn.sigmoid(c)
    ada = silu_c @ w_ada + b_ada
    shift, scale = ada[:, :H], ada[:, H:]
    mean = jnp.mean(x, axis=-1, keepdims=True)
    var = jnp.mean((x - mean) ** 2, axis=-1, keepdims=True)
    x_norm = (x - mean) * jax.lax.rsqrt(var + 1e-6)
    mod = x_norm * (1.0 + scale[:, None, :]) + shift[:, None, :]
    return mod @ w_lin + b_lin


if __name__ == "__main__":
    # Small shapes consistent with the module.
    B, T, H = 2, 8, 32
    patch_size, out_channels = 2, 4
    OUT = patch_size * out_channels

    key = jax.random.PRNGKey(0)
    kx, kc, kw1, kb1, kw2, kb2 = jax.random.split(key, 6)

    x = jax.random.normal(kx, (B, T, H), dtype=jnp.float32)
    c = jax.random.normal(kc, (B, H), dtype=jnp.float32)
    w_ada = jax.random.normal(kw1, (H, 2 * H), dtype=jnp.float32) * 0.05
    b_ada = jax.random.normal(kb1, (2 * H,), dtype=jnp.float32) * 0.05
    w_lin = jax.random.normal(kw2, (H, OUT), dtype=jnp.float32) * 0.05
    b_lin = jax.random.normal(kb2, (OUT,), dtype=jnp.float32) * 0.05

    ref = final_layer_ref(x, c, w_ada, b_ada, w_lin, b_lin)

    # f32: exercise both kernel variants (in-kernel modulate and folded modulate).
    out_a = jax.block_until_ready(
        final_layer(x, c, w_ada, b_ada, w_lin, b_lin, fold_modulate=False))
    out_b = jax.block_until_ready(
        final_layer(x, c, w_ada, b_ada, w_lin, b_lin, fold_modulate=True))
    assert out_a.shape == (B, T, OUT), out_a.shape
    assert jnp.allclose(out_a, ref, atol=1e-4, rtol=1e-4), "mismatch (in-kernel modulate)"
    assert jnp.allclose(out_b, ref, atol=1e-4, rtol=1e-4), "mismatch (folded modulate)"

    # bf16: exercises the ragged token tile (T=8 < 16-row bf16 tile) and the
    # bf16 MXU path; compared against the f32 reference at loose tolerance.
    xb, cb = x.astype(jnp.bfloat16), c.astype(jnp.bfloat16)
    wab, bab = w_ada.astype(jnp.bfloat16), b_ada.astype(jnp.bfloat16)
    wlb, blb = w_lin.astype(jnp.bfloat16), b_lin.astype(jnp.bfloat16)
    out_bf = jax.block_until_ready(final_layer(xb, cb, wab, bab, wlb, blb))
    assert out_bf.shape == (B, T, OUT), out_bf.shape
    assert bool(jnp.all(jnp.isfinite(out_bf.astype(jnp.float32)))), "non-finite bf16 output"
    assert jnp.allclose(out_bf.astype(jnp.float32), ref, atol=7e-2, rtol=7e-2), "bf16 mismatch"

    print("KERNEL_OK")
</pallas_src>

<mosaic_0001>
module attributes {stable_mosaic.version = 11 : i64} {
  func.func @final_layer_kernel(%arg0: i32, %arg1: i32, %arg2: memref<1x8x32xf32, #tpu.memory_space<vmem>>, %arg3: memref<1x1x32xf32, #tpu.memory_space<vmem>>, %arg4: memref<1x1x32xf32, #tpu.memory_space<vmem>>, %arg5: memref<32x128xf32, #tpu.memory_space<vmem>>, %arg6: memref<1x128xf32, #tpu.memory_space<vmem>>, %arg7: memref<1x8x128xf32, #tpu.memory_space<vmem>>) attributes {dimension_semantics = [#tpu.dimension_semantics<parallel>, #tpu.dimension_semantics<parallel>], iteration_bounds = array<i64: 2, 1>, scalar_prefetch = 0 : i64, scratch_operands = 0 : i64, tpu.core_type = #tpu.core_type<tc>, window_params = [{transform_indices = @transform_0, window_bounds = array<i64: 1, 8, 32>}, {transform_indices = @transform_1, window_bounds = array<i64: 1, 1, 32>}, {transform_indices = @transform_2, window_bounds = array<i64: 1, 1, 32>}, {pipeline_mode = #tpu.pipeline_mode<synchronous>, transform_indices = @transform_3, window_bounds = array<i64: 32, 128>}, {pipeline_mode = #tpu.pipeline_mode<synchronous>, transform_indices = @transform_4, window_bounds = array<i64: 1, 128>}, {transform_indices = @transform_5, window_bounds = array<i64: 1, 8, 128>}]} {
    %c0 = arith.constant 0 : index
    %c0_0 = arith.constant 0 : index
    %c0_1 = arith.constant 0 : index
    %0 = vector.load %arg2[%c0, %c0_0, %c0_1] : memref<1x8x32xf32, #tpu.memory_space<vmem>>, vector<1x8x32xf32>
    %1 = vector.shape_cast %0 : vector<1x8x32xf32> to vector<8x32xf32>
    %cst = arith.constant dense<0.000000e+00> : vector<8xf32>
    %2 = vector.multi_reduction <add>, %1, %cst [1] : vector<8x32xf32> to vector<8xf32>
    %3 = vector.shape_cast %2 : vector<8xf32> to vector<8x1xf32>
    %4 = arith.mulf %1, %1 : vector<8x32xf32>
    %cst_2 = arith.constant dense<0.000000e+00> : vector<8xf32>
    %5 = vector.multi_reduction <add>, %4, %cst_2 [1] : vector<8x32xf32> to vector<8xf32>
    %6 = vector.shape_cast %5 : vector<8xf32> to vector<8x1xf32>
    %cst_3 = arith.constant 3.125000e-02 : f32
    %7 = vector.broadcast %cst_3 : f32 to vector<8x1xf32>
    %8 = arith.mulf %3, %7 : vector<8x1xf32>
    %cst_4 = arith.constant 3.125000e-02 : f32
    %9 = vector.broadcast %cst_4 : f32 to vector<8x1xf32>
    %10 = arith.mulf %6, %9 : vector<8x1xf32>
    %11 = arith.mulf %8, %8 : vector<8x1xf32>
    %12 = arith.subf %10, %11 : vector<8x1xf32>
    %cst_5 = arith.constant 9.99999997E-7 : f32
    %13 = vector.broadcast %cst_5 : f32 to vector<8x1xf32>
    %14 = arith.addf %12, %13 : vector<8x1xf32>
    %15 = math.rsqrt %14 : vector<8x1xf32>
    %c0_6 = arith.constant 0 : index
    %c0_7 = arith.constant 0 : index
    %c0_8 = arith.constant 0 : index
    %16 = vector.load %arg3[%c0_6, %c0_7, %c0_8] : memref<1x1x32xf32, #tpu.memory_space<vmem>>, vector<1x1x32xf32>
    %17 = vector.shape_cast %16 : vector<1x1x32xf32> to vector<1x32xf32>
    %c0_9 = arith.constant 0 : index
    %c0_10 = arith.constant 0 : index
    %c0_11 = arith.constant 0 : index
    %18 = vector.load %arg4[%c0_9, %c0_10, %c0_11] : memref<1x1x32xf32, #tpu.memory_space<vmem>>, vector<1x1x32xf32>
    %19 = vector.shape_cast %18 : vector<1x1x32xf32> to vector<1x32xf32>
    %cst_12 = arith.constant 1.000000e+00 : f32
    %20 = vector.broadcast %cst_12 : f32 to vector<1x32xf32>
    %21 = arith.addf %20, %19 : vector<1x32xf32>
    %22 = vector.broadcast %8 : vector<8x1xf32> to vector<8x32xf32>
    %23 = arith.subf %1, %22 : vector<8x32xf32>
    %24 = vector.broadcast %15 : vector<8x1xf32> to vector<8x32xf32>
    %25 = arith.mulf %23, %24 : vector<8x32xf32>
    %26 = vector.broadcast %21 : vector<1x32xf32> to vector<8x32xf32>
    %27 = arith.mulf %25, %26 : vector<8x32xf32>
    %28 = vector.broadcast %17 : vector<1x32xf32> to vector<8x32xf32>
    %29 = arith.addf %27, %28 : vector<8x32xf32>
    %c0_13 = arith.constant 0 : index
    %c0_14 = arith.constant 0 : index
    %30 = vector.load %arg5[%c0_13, %c0_14] : memref<32x128xf32, #tpu.memory_space<vmem>>, vector<32x128xf32>
    %cst_15 = arith.constant dense<0.000000e+00> : vector<8x128xf32>
    %31 = tpu.matmul %29, %30, %cst_15 {dimension_numbers = #tpu.dot_dimension_numbers<[1], [0], [0], [1], [0, 0, 1, 1], [], []>} : vector<8x32xf32>, vector<32x128xf32>, vector<8x128xf32> -> vector<8x128xf32>
    %c0_16 = arith.constant 0 : index
    %c0_17 = arith.constant 0 : index
    %32 = vector.load %arg6[%c0_16, %c0_17] : memref<1x128xf32, #tpu.memory_space<vmem>>, vector<1x128xf32>
    %33 = vector.broadcast %32 : vector<1x128xf32> to vector<8x128xf32>
    %34 = arith.addf %31, %33 : vector<8x128xf32>
    %c0_18 = arith.constant 0 : index
    %c0_19 = arith.constant 0 : index
    %c0_20 = arith.constant 0 : index
    %35 = vector.load %arg7[%c0_18, %c0_19, %c0_20] : memref<1x8x128xf32, #tpu.memory_space<vmem>>, vector<1x8x128xf32>
    %36 = vector.shape_cast %35 : vector<1x8x128xf32> to vector<8x128xf32>
    %37 = vector.shape_cast %34 : vector<8x128xf32> to vector<1x8x128xf32>
    tpu.vector_store %arg7[%c0_18, %c0_19, %c0_20], %37 {strides = array<i32>} : memref<1x8x128xf32, #tpu.memory_space<vmem>>, vector<1x8x128xf32>,
    return
  }
  func.func @transform_0(%arg0: i32, %arg1: i32) -> (i32, i32, i32) {
    %c0_i32 = arith.constant 0 : i32
    %c0_i32_0 = arith.constant 0 : i32
    return %arg0, %arg1, %c0_i32 : i32, i32, i32
  }
  func.func @transform_1(%arg0: i32, %arg1: i32) -> (i32, i32, i32) {
    %c0_i32 = arith.constant 0 : i32
    %c0_i32_0 = arith.constant 0 : i32
    %c0_i32_1 = arith.constant 0 : i32
    return %arg0, %c0_i32, %c0_i32_0 : i32, i32, i32
  }
  func.func @transform_2(%arg0: i32, %arg1: i32) -> (i32, i32, i32) {
    %c0_i32 = arith.constant 0 : i32
    %c0_i32_0 = arith.constant 0 : i32
    %c0_i32_1 = arith.constant 0 : i32
    return %arg0, %c0_i32, %c0_i32_0 : i32, i32, i32
  }
  func.func @transform_3(%arg0: i32, %arg1: i32) -> (i32, i32) {
    %c0_i32 = arith.constant 0 : i32
    %c0_i32_0 = arith.constant 0 : i32
    %c0_i32_1 = arith.constant 0 : i32
    return %c0_i32, %c0_i32_0 : i32, i32
  }
  func.func @transform_4(%arg0: i32, %arg1: i32) -> (i32, i32) {
    %c0_i32 = arith.constant 0 : i32
    %c0_i32_0 = arith.constant 0 : i32
    %c0_i32_1 = arith.constant 0 : i32
    return %c0_i32, %c0_i32_0 : i32, i32
  }
  func.func @transform_5(%arg0: i32, %arg1: i32) -> (i32, i32, i32) {
    %c0_i32 = arith.constant 0 : i32
    %c0_i32_0 = arith.constant 0 : i32
    return %arg0, %arg1, %c0_i32 : i32, i32, i32
  }
}

</mosaic_0001>

<bundles_post_ra>
// kernel: tpu_custom_call.1
= control target key start
LH: loop header
LB: loop body
LE: loop exit
PB: predicated region body
PF: predicated region fallthrough
CT: control target
= control target key end

     0   :  { %10 = vsyncpa [#allocation3], 0  ;;  %s1078_s0 = inlined_call_operand.hbm [shape: f32[2,8,32], index: 0, kind: input, shape index: {}]   ;;  %s1079_s1 = inlined_call_operand.vmem [shape: f32[2,1,32], index: 1, kind: input, shape index: {}]   ;;  %s1080_s2 = inlined_call_operand.vmem [shape: f32[2,1,32], index: 2, kind: input, shape index: {}]   ;;  %s1081_s3 = inlined_call_operand.hbm [shape: f32[32,128], index: 3, kind: input, shape index: {}]   ;;  %s1082_s4 = inlined_call_operand.vmem [shape: f32[1,128], index: 4, kind: input, shape index: {}]   ;;  %s1083_s5 = inlined_call_operand.hbm [shape: f32[2,8,128], index: 5, kind: output, shape index: {}]  }
   0x1   :  { %12 = vsyncpa [#allocation3 + $0x1], 0 }
   0x2   :  { %13 = vsyncpa [#allocation6], 0 }
   0x3   :  { %14 = vsyncpa [#allocation4], 0 }
   0x4   :  { %16 = vsyncpa [#allocation4 + $0x1], 0  ;;  %s846_s18 = smov 0   ;;  %s848_s19 = smov 0  }
   0x5   :  { %s850_s20 = smov 0   ;;  %s852_s21 = smov 0  }
   0x6   :  { %s854_s22 = smov 0   ;;  %s856_s23 = smov 0  }
   0x7 LB: > { %s542_s24 = sadd.s32 4294967295, %s806_s23   ;;  %s543_s25 = sadd.s32 4294967294, %s806_s23   ;;  %s806_s23 = sphi %s856_s23, %s22_s23   ;;  %s802_s22 = sphi %s854_s22, %s1107_s22   ;;  %s798_s21 = sphi %s852_s21, %s1106_s21   ;;  %s794_s20 = sphi %s850_s20, %s1105_s20   ;;  %s790_s19 = sphi %s848_s19, %s1104_s19   ;;  %s786_s18 = sphi %s846_s18, %s1103_s18  }
   0x8   : > { %p56_p0 = scmp.ne.s32.totalorder %s790_s19, %s786_s18  ;;  %p880_p1 = scmp.eq.s32.totalorder %s542_s24, 0 }
   0x9   : > { %p884_p2 = scmp.eq.s32.totalorder %s542_s24, 1  ;;  %p182_p3 = scmp.eq.s32.totalorder %s543_s25, 1 }
   0xa   : > { %s1088_s26 = scalar_select %p880_p1, 1, 0 }
   0xb   : > { %s1089_s27 = scalar_select %p884_p2, 1, 0 }
   0xc   : > { %p890_p4 = por %p880_p1, %p56_p0  ;;  %p544_p5 = scmp.ge.s32.totalorder %s806_s23, 1 }
   0xd   : > { %p895_p6 = por %p182_p3, %p56_p0  ;;  %p189_p7 = scmp.lt.s32.totalorder %s806_s23, 3 }
   0xe   : > { %s1090_s28 = scalar_select %p890_p4, 1, 0 }
   0xf   : > { %s1091_s29 = scalar_select %p895_p6, 1, 0 }
  0x10   : > { %p900_p8 = pnand %p544_p5, %p189_p7  ;;  %s808_s6 = smov [#allocation5]  }
  0x11   : > { %s201_s7 = sshll.u32 %s808_s6, 4  ;;  %s34_s9 = sadd.s32 1, %s802_s22  ;;  %s202_s7 = int_to_ptr.vmem [resolvable:$true] %s201_s7 }
  0x12   : > { %s1092_s30 = scalar_select %p900_p8, 1, 0 }
  0x13   : > { %p590_p9 = pneg %p900_p8  ;;  %s662_s12 = scalar_lea.hbm %s1081_s3, 512 }
  0x14   : > { %p663_p12 = scmp.ne.s32.totalorder %s1081_s3, %s662_s12  ;;  %p669_p5 = scmp.lt.u32.totalorder %s662_s12, %s1081_s3 }
  0x15   : > { %p909_p11 = pnand %p590_p9, %p880_p1 }
  0x17   : > { %p664_p13 = pneg %p909_p11 }
  0x19   : > { %p665_p0 = pnand %p664_p13, %p663_p12 }
  0x1b   : > { %p666_p3 = pneg %p665_p0 }
  0x1d   : > { %p671_p7 = pnand %p669_p5, %p666_p3 }
  0x1f   : > { %674 = shalt.err (!%p671_p7)
}
  0x20   : > { %s675_s17 = scalar_lea.vmem %s202_s7, 512  ;;  %p683_p1 = scmp.lt.s32.totalorder %s202_s7, %s202_s7 }
  0x21   : > { %p676_p9 = scmp.ne.s32.totalorder %s202_s7, %s675_s17  ;;  %p684_p4 = scmp.lt.s32.totalorder %s675_s17, %s675_s17 }
  0x23   : > { %p678_p10 = pnand %p676_p9, %p664_p13  ;;  %p685_p8 = por %p684_p4, %p683_p1 }
  0x25   : > { %p679_p6 = pneg %p678_p10 }
  0x27   : > { %p686_p2 = pnand %p685_p8, %p679_p6 }
  0x29   : > { %689 = shalt.err (!%p686_p2)
}
  0x2a   : > { %s809_s24 = smov 128   ;;  %s810_s25 = smov 8  }
  0x2b   : > { %593 = dma.hbm_to_vmem [thread:$0]  (!%p909_p11), %s1081_s3, 512, %s202_s7, [#allocation6], %s809_s24, %s809_s24, %s810_s25  }
  0x2c   : > { %p36_p1 = scmp.ge.s32.totalorder %s34_s9, 2  ;;  %s43_s11 = sadd.s32 1, %s794_s20 }
  0x2d   : > { %p50_p2 = scmp.ne.s32.totalorder %s794_s20, %s790_s19  ;;  %p51_p4 = scmp.eq.s32.totalorder %s806_s23, 0 }
  0x2e   : > { %s1109_s9 = smov (%p36_p1, %s34_s9), 0  ;;  %p1095_p8 = scmp.ne.s32.totalorder %s1089_s27, 0 }
  0x2f   : > { %p936_p6 = por %p51_p4, %p50_p2  ;;  %s38_s8 = ssub.s32 %s802_s22, %s1109_s9 }
  0x30   : > { %p942_p10 = por %p1095_p8, %p50_p2  ;;  %p603_p12 = scmp.lt.s32.totalorder %s806_s23, 2 }
  0x31   : > { %p41_p11 = scmp.eq.s32.totalorder %s38_s8, 0  ;;  %s218_s7 = sand.u32 1, %s794_s20  }
  0x32   : > { %s547_s14 = sshll.u32 %s218_s7, 3  ;;  %s548_s16 = sshll.u32 %s802_s22, 7 }
  0x33   : > { %s951_s15 = scalar_select %p41_p11, %s794_s20, %s43_s11  }
  0x34   : > { %s957_s25 = scalar_lea.hbm %s1078_s0, %s548_s16  ;;  %s222_s27 = scalar_lea.vmem [#allocation2], %s547_s14 }
  0x35   : > { %s230_s6 = sshll.u32 %s222_s27, 4  ;;  %p963_p13 = pnand %p603_p12, %p936_p6  ;;  %s959_s6 = int_to_ptr.vmem [resolvable:$true] %s230_s6 }
  0x36   : > { %s219_s11 = scalar_lea.sflag [#allocation3], %s218_s7  ;;  %s690_s8 = scalar_lea.hbm %s957_s25, 128 }
  0x37   : > { %p691_p0 = scmp.ne.s32.totalorder %s957_s25, %s690_s8  ;;  %p692_p3 = pneg %p963_p13 }
  0x38   : > { %s695_s17 = scalar_lea.hbm %s1078_s0, 256  ;;  %p696_p9 = scmp.lt.u32.totalorder %s957_s25, %s1078_s0 }
  0x39   : > { %p693_p5 = pnand %p692_p3, %p691_p0  ;;  %p697_p1 = scmp.lt.u32.totalorder %s695_s17, %s690_s8 }
  0x3a   : > { %p699_p4 = scmp.lt.u32.totalorder %s690_s8, %s957_s25 }
  0x3b   : > { %p694_p7 = pneg %p693_p5  ;;  %p698_p2 = por %p697_p1, %p696_p9 }
  0x3d   : > { %p700_p6 = por %p699_p4, %p698_p2 }
  0x3f   : > { %p701_p8 = pnand %p700_p6, %p694_p7 }
  0x41   : > { %704 = shalt.err (!%p701_p8)
}
  0x42   : > { %s705_s7 = scalar_lea.vmem %s959_s6, 128  ;;  %s811_s27 = smov [#allocation2]  }
  0x43   : > { %p706_p12 = scmp.ne.s32.totalorder %s959_s6, %s705_s7  ;;  %s710_s14 = sshll.u32 %s811_s27, 4  ;;  %s711_s14 = int_to_ptr.vmem [resolvable:$false] %s710_s14 }
  0x44   : > { %s712_s16 = scalar_lea.vmem %s711_s14, 256  ;;  %p713_p5 = scmp.lt.s32.totalorder %s959_s6, %s711_s14 }
  0x45   : > { %p708_p11 = pnand %p706_p12, %p692_p3  ;;  %p714_p9 = scmp.lt.s32.totalorder %s712_s16, %s705_s7 }
  0x47   : > { %p709_p0 = pneg %p708_p11  ;;  %p715_p1 = por %p714_p9, %p713_p5 }
  0x49   : > { %p716_p2 = pnand %p715_p1, %p709_p0 }
  0x4b   : > { %719 = shalt.err (!%p716_p2)
}
  0x4c   : > { %597 = dma.hbm_to_vmem [thread:$0]  (!%p963_p13), %s957_s25, 128, %s959_s6, %s219_s11  }
  0x4d   : > { %p1098_p7 = scmp.ne.s32.totalorder %s1092_s30, 0 }
  0x4e   : > { %s995_s8 = sand.u32 (!%p1098_p7), 1, %s790_s19   ;;  %p1099_p3 = scmp.ne.s32.totalorder (!%p1098_p7), %s1090_s28, 0 }
  0x4f   : > { %251 = sbr.rel (%p1098_p7) target bundleno = 489 (0x1e9), region = 40  ;;  %s550_s17 = sshll.u32 (!%p1098_p7), %s995_s8, 3 }
  0x50   : > { %s254_s12 = scalar_lea.sflag (!%p1098_p7), [#allocation3], %s995_s8  ;;  %s257_s24 = scalar_lea.vmem (!%p1098_p7), [#allocation2], %s550_s17 }
  0x56   : > { %773 = dma.done.wait (%p1099_p3), %s254_s12, 128  }
  0x57   : > { %775 = vsyncadd (%p1099_p3), %s254_s12, 4294967168  ;;  %p1100_p13 = scmp.ne.s32.totalorder %s1088_s26, 0 }
  0x59   : > { %777 = dma.done.wait (%p1100_p13), [#allocation6], 512  }
  0x5a   : > { %779 = vsyncadd (%p1100_p13), [#allocation6], 4294966784  ;;  %vm301_vm0 = vcmask 261120   ;;  %v300_v0 = vld [vmem:[%s257_s24] sm:$0xff]  ;;  %v334_v4 = vld [vmem:[#allocation5] sm:$0xff]  ;;  %v812_v7 = vmov 0.0|0.0   ;;  %v321_v18 = vlaneseq }
  0x5b   : > { %v302_v1 = vsel %vm301_vm0, %v300_v0, 0.0  ;;  %v305_v2 = vmul.f32 %v300_v0, %v300_v0  ;;  %v335_v5 = vld [vmem:[#allocation5 + $0x8] sm:$0xff]  ;;  %v336_v6 = vld [vmem:[#allocation5 + $0x10] sm:$0xff]  ;;  %576 = vmatprep.subr.bf16.mxu0 %v812_v7  ;;  %v337_v9 = vld [vmem:[#allocation5 + $0x18] sm:$0xff]  ;;  %vm813_vm1 = vmmov 0   ;;  %v814_v10 = vmov 0.0  }
  0x5c   : > { %303 = vadd.xlane.f32.xlu0 %v302_v1  ;;  %v577_v8 = vpack.c.bf16 %v335_v5, %v334_v4  ;;  %573 = vmatprep.mubr.msk.f32.mxu0 %vm813_vm1, %v814_v10  ;;  %v580_v11 = vpack.c.bf16 %v337_v9, %v336_v6  ;;  %p294_p4 = scmp.lt.s32.totalorder %s798_s21, 1  ;;  %v322_v20 = vshrl.u32 %v321_v18, 7  ;;  %v554_v31 = vld [vmem:[%s1082_s4] ss:$0 sm:$0xff]  ;;  %s557_s14 = sshll.u32 %s798_s21, 7 }
  0x5d   : > { %v306_v3 = vsel %vm301_vm0, %v305_v2, 0.0  ;;  %s293_s16 = scalar_lea.vmem [#allocation7], %s550_s17  ;;  %s1029_s28 = scalar_lea.hbm %s1083_s5, %s557_s14 }
  0x5e   : > { %578 = vmatpush3.bf16.msra.mxu0 %v577_v8  ;;  %s295_s26 = scalar_select %p294_p4, %s798_s21, 1  ;;  %v323_v23 = vsub.s32 0, %v322_v20 }
  0x5f   : > { %579 = vmatprep.subr.bf16.mxu0 %v812_v7  ;;  %s434_s12 = sshll.u32 %s293_s16, 4  ;;  %s420_s30 = scalar_lea.sflag [#allocation4], %s995_s8  ;;  %s1031_s12 = int_to_ptr.vmem [resolvable:$true] %s434_s12 }
  0x60   : > { %307 = vadd.xlane.f32.xlu0 %v306_v3  ;;  %s299_s25 = scalar_lea.vmem %s1080_s2, %s295_s26  ;;  %s296_s11 = scalar_lea.vmem %s1079_s1, %s295_s26 }
  0x61   : > { %v316_v21 = vld [vmem:[%s299_s25] sm:$0x1]  ;;  %s720_s25 = scalar_lea.vmem %s1031_s12, 128  ;;  %s815_s21 = smov [#allocation7]  }
  0x62   : > { %581 = vmatpush3.bf16.msra.mxu0 %v580_v11  ;;  %v317_v22 = vadd.f32 1.0, %v316_v21  ;;  %v553_v28 = vld [vmem:[%s296_s11] ss:$0 sm:$0xff]  ;;  %p721_p6 = scmp.ne.s32.totalorder %s1031_s12, %s720_s25  ;;  %s724_s17 = sshll.u32 %s815_s21, 4  ;;  %s725_s17 = int_to_ptr.vmem [resolvable:$false] %s724_s17 }
  0x63   : > { %s726_s6 = scalar_lea.vmem %s725_s17, 256  ;;  %p727_p11 = scmp.lt.s32.totalorder %s1031_s12, %s725_s17 }
  0x64   : > { %v324_v25 = vrot.slane %v317_v22, %v323_v23  ;;  %p722_p8 = pnand %p721_p6, %p942_p10  ;;  %p728_p0 = scmp.lt.s32.totalorder %s726_s6, %s720_s25 }
  0x66   : > { %p723_p12 = pneg %p722_p8  ;;  %p729_p5 = por %p728_p0, %p727_p11 }
  0x68   : > { %p730_p9 = pnand %p729_p5, %p723_p12 }
  0xe9   : > { %v304_v12 = vpop.xlane.xlu0 %303 }
  0xea   : > { %v309_v13 = vmul.f32 0.03125, %v304_v12 }
  0xec   : > { %v311_v15 = vmul.f32 %v309_v13, %v309_v13  ;;  %v318_v24 = vsub.f32 %v300_v0, %v309_v13 }
  0xed   : > { %v308_v14 = vpop.xlane.xlu0 %307 }
  0xee   : > { %v310_v16 = vmul.f32 0.03125, %v308_v14 }
  0xf0   : > { %v312_v17 = vsub.f32 %v310_v16, %v311_v15 }
  0xf2   : > { %v313_v19 = vadd.f32 1e-06, %v312_v17 }
  0xf4   : > { %660 = vrsqrt.f32 %v313_v19 }
  0xfe   : > { %v661_v26 = vpop.eup %660 }
  0xff   : > { %v319_v27 = vmul.f32 %v661_v26, %v318_v24 }
 0x101   : > { %v326_v29 = vmul.f32 %v324_v25, %v319_v27 }
 0x103   : > { %v333_v30 = vadd.f32 %v553_v28, %v326_v29 }
 0x105   : > { %574 = vmatmul.mubr.msk.f32.vlgmr.msra.gmra.mrb[0].mxu0 %vm301_vm0, %v333_v30 }
 0x1d8   : > { %v414_v32 = vpop.f32.mrb[0].mxu0 }
 0x1d9   : > { %v415_v33 = vadd.f32 %v554_v31, %v414_v32  ;;  %v575_v34 = vpop.f32.mrb[1].mxu0 }
 0x1db   : > { %418 = vst [vmem:[%s293_s16] sm:$0xff] %v415_v33 }
 0x1dc   : > { %733 = shalt.err (!%p730_p9)
}
 0x1dd   : > { %s734_s8 = scalar_lea.hbm %s1029_s28, 128  ;;  %s738_s7 = scalar_lea.hbm %s1083_s5, 256 }
 0x1de   : > { %p735_p1 = scmp.ne.s32.totalorder %s1029_s28, %s734_s8  ;;  %p739_p3 = scmp.lt.u32.totalorder %s1029_s28, %s1083_s5 }
 0x1df   : > { %p740_p13 = scmp.lt.u32.totalorder %s738_s7, %s734_s8  ;;  %p742_p6 = scmp.lt.u32.totalorder %s734_s8, %s1029_s28 }
 0x1e0   : > { %p736_p2 = pnand %p735_p1, %p942_p10 }
 0x1e1   : > { %p741_p4 = por %p740_p13, %p739_p3 }
 0x1e2   : > { %p737_p7 = pneg %p736_p2 }
 0x1e3   : > { %p743_p8 = por %p742_p6, %p741_p4 }
 0x1e5   : > { %p744_p12 = pnand %p743_p8, %p737_p7 }
 0x1e7   : > { %747 = shalt.err (!%p744_p12)
}
 0x1e8   : > { %588 = dma.vmem_to_hbm [thread:$0]  (%p942_p10), %s1031_s12, 128, %s1029_s28, %s420_s30  }
 0x1e9 PF: > { %s446_s16 = sand.u32 1, %s786_s18   ;;  %p1101_p11 = scmp.ne.s32.totalorder %s1091_s29, 0 }
 0x1ea   : > { %p1102_p0 = scmp.ge.s32.totalorder %s806_s23, 2  ;;  %s447_s24 = scalar_lea.sflag [#allocation4], %s446_s16 }
 0x1ec   : > { %p599_p5 = pnand %p1102_p0, %p1101_p11 }
 0x1ee   : > { %781 = dma.done.wait (!%p599_p5), %s447_s24, 128  }
 0x1ef   : > { %783 = vsyncadd (!%p599_p5), %s447_s24, 4294967168  ;;  %s22_s23 = sadd.s32 1, %s806_s23   ;;  %s1103_s18 = smov %s790_s19 }
 0x1f0   : > { %p19_p9 = scmp.ge.s32.totalorder %s22_s23, 4   ;;  %s1104_s19 = smov %s794_s20 }
 0x1f1   : > { %s1105_s20 = smov %s951_s15  ;;  %s1106_s21 = smov %s802_s22 }
 0x1f2   : > { %s1107_s22 = smov %s1109_s9  ;;  %21 = sbr.rel (!%p19_p9) target bundleno = 7 (0x7), region = 95 }
 0x1f9   :  { %452 = vsyncpa [#allocation3], 1 }
 0x1fa   :  { %454 = vsyncpa [#allocation3 + $0x1], 1 }
 0x1fb   :  { %455 = vsyncpa [#allocation6], 1 }
 0x1fc   :  { %456 = vsyncpa [#allocation4], 1 }
 0x1fd   :  { %458 = vsyncpa [#allocation4 + $0x1], 1 }

</bundles_post_ra>
